<compile_context>
chip_gen: v7x
topology: tpu7x:2x2x1
jax: 0.10.0
libtpu: 0.0.40
codegen_flags: <defaults>
</compile_context>

<pallas_src>
import functools

import jax
import jax.numpy as jnp
from jax.experimental import pallas as pl
from jax.experimental.pallas import tpu as pltpu


# -----------------------------------------------------------------------------
# Kernel
# -----------------------------------------------------------------------------
def dueling_kernel(x_ref,
                   w1_ref, b1_ref,
                   w2_ref, b2_ref,
                   w3_ref, b3_ref,
                   w4_ref, b4_ref,
                   out_ref,
                   *, action_size):
    bf16 = jnp.bfloat16
    f32 = jnp.float32

    # Activations are cast to bf16 before each MXU push; accumulation stays f32.
    x = x_ref[...].astype(bf16)

    h = jnp.maximum(
        jnp.dot(x, w1_ref[...], preferred_element_type=f32) + b1_ref[...], 0.0)
    h = jnp.maximum(
        jnp.dot(h.astype(bf16), w2_ref[...], preferred_element_type=f32)
        + b2_ref[...], 0.0)

    # Fused adv3/val3 head: one (128, 128) matmul instead of two (128, 64) ones.
    h = jnp.maximum(
        jnp.dot(h.astype(bf16), w3_ref[...], preferred_element_type=f32)
        + b3_ref[...], 0.0)

    # Fused adv4/val4 head via block-diagonal weight: one (128, A+1) matmul.
    h4 = jnp.maximum(
        jnp.dot(h.astype(bf16), w4_ref[...], preferred_element_type=f32)
        + b4_ref[...], 0.0)

    adv = h4[:, :action_size]                     # (T, A)
    val = h4[:, action_size:action_size + 1]      # (T, 1) -> broadcasts (= torch .expand)

    mean_adv = jnp.mean(adv, axis=1, keepdims=True)   # XLU reduction, free slot
    out_ref[...] = (val + adv - mean_adv).astype(out_ref.dtype)


# -----------------------------------------------------------------------------
# Wrapper
# -----------------------------------------------------------------------------
def _round_up(n, m):
    return ((n + m - 1) // m) * m


def _fuse_params(params):
    """Concatenate the dueling heads and cast weights to bf16 (f32 biases)."""
    bf16 = jnp.bfloat16
    sf = params["wa4"].shape[0]          # start_filter (64)
    A = params["wa4"].shape[1]           # action_size

    w3 = jnp.concatenate([params["wa3"], params["wv3"]], axis=1)   # (128, 128)
    b3 = jnp.concatenate([params["ba3"], params["bv3"]], axis=1)   # (1, 128)

    # Block-diagonal fusion of adv4 / val4: rows 0:sf feed adv, rows sf:2sf feed val.
    w4 = jnp.zeros((2 * sf, A + 1), jnp.float32)
    w4 = w4.at[:sf, :A].set(params["wa4"])
    w4 = w4.at[sf:, A:].set(params["wv4"])
    b4 = jnp.concatenate([params["ba4"], params["bv4"]], axis=1)   # (1, A+1)

    return dict(
        w1=params["w1"].astype(bf16), b1=params["b1"],
        w2=params["w2"].astype(bf16), b2=params["b2"],
        w3=w3.astype(bf16),           b3=b3,
        w4=w4.astype(bf16),           b4=b4,
    )


def dueling_qnetwork_forward(state, params, tile_b=512):
    """state: (B, state_size) f32. Returns (B, action_size) f32 Q-values."""
    B, S = state.shape
    A = params["wa4"].shape[1]
    fp = _fuse_params(params)
    H1 = fp["w1"].shape[1]    # 64
    H2 = fp["w2"].shape[1]    # 128

    # Batch tile: multiple of 8 (f32 sublane); pad the batch so every block is full.
    TILE_B = min(tile_b, _round_up(B, 8))
    padded_B = _round_up(B, TILE_B)
    if padded_B != B:
        state = jnp.pad(state, ((0, padded_B - B), (0, 0)))
    grid = (padded_B // TILE_B,)

    # Weights / biases: full-array blocks with constant index_map -> DMA'd once,
    # resident in VMEM across all batch tiles.
    const = lambda i: (0, 0)
    weight_args = (fp["w1"], fp["b1"], fp["w2"], fp["b2"],
                   fp["w3"], fp["b3"], fp["w4"], fp["b4"])
    weight_specs = [pl.BlockSpec(w.shape, const) for w in weight_args]

    flops = 2 * padded_B * (S * H1 + H1 * H2 + H2 * H2 + H2 * (A + 1))
    weight_bytes = sum(int(w.size) * w.dtype.itemsize for w in weight_args)
    bytes_accessed = padded_B * (S + A) * 4 + weight_bytes

    out = pl.pallas_call(
        functools.partial(dueling_kernel, action_size=A),
        out_shape=jax.ShapeDtypeStruct((padded_B, A), jnp.float32),
        grid=grid,
        in_specs=[pl.BlockSpec((TILE_B, S), lambda i: (i, 0))] + weight_specs,
        out_specs=pl.BlockSpec((TILE_B, A), lambda i: (i, 0)),
        compiler_params=pltpu.CompilerParams(
            dimension_semantics=("parallel",),        # 2x on v7x (2 TCs), no-op on v5e/v6e
            vmem_limit_bytes=32 * 1024 * 1024,        # safe headroom, incl. v5e default limit
        ),
        cost_estimate=pl.CostEstimate(
            flops=flops, transcendentals=0, bytes_accessed=bytes_accessed),
    )(state, *weight_args)

    return out[:B]


# -----------------------------------------------------------------------------
# Params (torch.nn.Linear-style init; weights stored as (in, out))
# -----------------------------------------------------------------------------
def init_params(key, state_size, action_size, start_filter=64, layers=1):
    assert layers == 1, "kernel specializes the default layers=1 configuration"
    lst_filter = start_filter * 2 ** layers  # 128

    dims = {
        "1":  (state_size, start_filter),     # fc1
        "2":  (start_filter, lst_filter),     # fc2
        "a3": (lst_filter, start_filter),     # fc_adv3
        "v3": (lst_filter, start_filter),     # fc_val3
        "a4": (start_filter, action_size),    # fc_adv4
        "v4": (start_filter, 1),              # fc_val4
    }
    params = {}
    keys = jax.random.split(key, 2 * len(dims))
    for i, (name, (fan_in, fan_out)) in enumerate(dims.items()):
        bound = 1.0 / jnp.sqrt(jnp.float32(fan_in))
        params[f"w{name}"] = jax.random.uniform(
            keys[2 * i], (fan_in, fan_out), jnp.float32, -bound, bound)
        params[f"b{name}"] = jax.random.uniform(
            keys[2 * i + 1], (1, fan_out), jnp.float32, -bound, bound)
    return params


def reference_forward(state, p):
    """Plain-JAX f32 reference of the same forward (sanity check)."""
    relu = lambda z: jnp.maximum(z, 0.0)
    h = relu(state @ p["w1"] + p["b1"])
    h = relu(h @ p["w2"] + p["b2"])
    adv = relu(h @ p["wa3"] + p["ba3"])
    val = relu(h @ p["wv3"] + p["bv3"])
    adv = relu(adv @ p["wa4"] + p["ba4"])
    val = relu(val @ p["wv4"] + p["bv4"])
    return val + adv - jnp.mean(adv, axis=1, keepdims=True)


if __name__ == "__main__":
    B, state_size, action_size = 2, 8, 4

    key = jax.random.PRNGKey(0)
    pkey, xkey = jax.random.split(key)
    params = init_params(pkey, state_size, action_size)
    state = jax.random.normal(xkey, (B, state_size), jnp.float32)

    out = dueling_qnetwork_forward(state, params)
    out = jax.block_until_ready(out)

    ref = reference_forward(state, params)
    assert out.shape == (B, action_size)
    # Tolerance loosened vs. the pure-f32 version because MXU inputs are bf16
    # (accumulation stays f32).
    assert jnp.allclose(out, ref, atol=2e-2, rtol=2e-2), (out, ref)

    print("KERNEL_OK")
</pallas_src>

<mosaic_0001>
module attributes {stable_mosaic.version = 11 : i64} {
  func.func @dueling_kernel(%arg0: i32, %arg1: memref<8x8xf32, #tpu.memory_space<vmem>>, %arg2: memref<8x64xbf16, #tpu.memory_space<vmem>>, %arg3: memref<1x64xf32, #tpu.memory_space<vmem>>, %arg4: memref<64x128xbf16, #tpu.memory_space<vmem>>, %arg5: memref<1x128xf32, #tpu.memory_space<vmem>>, %arg6: memref<128x128xbf16, #tpu.memory_space<vmem>>, %arg7: memref<1x128xf32, #tpu.memory_space<vmem>>, %arg8: memref<128x5xbf16, #tpu.memory_space<vmem>>, %arg9: memref<1x5xf32, #tpu.memory_space<vmem>>, %arg10: memref<8x4xf32, #tpu.memory_space<vmem>>) attributes {dimension_semantics = [#tpu.dimension_semantics<parallel>], iteration_bounds = array<i64: 1>, scalar_prefetch = 0 : i64, scratch_operands = 0 : i64, tpu.core_type = #tpu.core_type<tc>, window_params = [{transform_indices = @transform_0, window_bounds = array<i64: 8, 8>}, {pipeline_mode = #tpu.pipeline_mode<synchronous>, transform_indices = @transform_1, window_bounds = array<i64: 8, 64>}, {pipeline_mode = #tpu.pipeline_mode<synchronous>, transform_indices = @transform_2, window_bounds = array<i64: 1, 64>}, {pipeline_mode = #tpu.pipeline_mode<synchronous>, transform_indices = @transform_3, window_bounds = array<i64: 64, 128>}, {pipeline_mode = #tpu.pipeline_mode<synchronous>, transform_indices = @transform_4, window_bounds = array<i64: 1, 128>}, {pipeline_mode = #tpu.pipeline_mode<synchronous>, transform_indices = @transform_5, window_bounds = array<i64: 128, 128>}, {pipeline_mode = #tpu.pipeline_mode<synchronous>, transform_indices = @transform_6, window_bounds = array<i64: 1, 128>}, {pipeline_mode = #tpu.pipeline_mode<synchronous>, transform_indices = @transform_7, window_bounds = array<i64: 128, 5>}, {pipeline_mode = #tpu.pipeline_mode<synchronous>, transform_indices = @transform_8, window_bounds = array<i64: 1, 5>}, {transform_indices = @transform_9, window_bounds = array<i64: 8, 4>}]} {
    %c0 = arith.constant 0 : index
    %c0_0 = arith.constant 0 : index
    %0 = vector.load %arg1[%c0, %c0_0] : memref<8x8xf32, #tpu.memory_space<vmem>>, vector<8x8xf32>
    %1 = arith.truncf %0 : vector<8x8xf32> to vector<8x8xbf16>
    %c0_1 = arith.constant 0 : index
    %c0_2 = arith.constant 0 : index
    %2 = vector.load %arg2[%c0_1, %c0_2] : memref<8x64xbf16, #tpu.memory_space<vmem>>, vector<8x64xbf16>
    %cst = arith.constant dense<0.000000e+00> : vector<8x64xf32>
    %3 = tpu.matmul %1, %2, %cst {dimension_numbers = #tpu.dot_dimension_numbers<[1], [0], [0], [1], [0, 0, 1, 1], [], []>} : vector<8x8xbf16>, vector<8x64xbf16>, vector<8x64xf32> -> vector<8x64xf32>
    %c0_3 = arith.constant 0 : index
    %c0_4 = arith.constant 0 : index
    %4 = vector.load %arg3[%c0_3, %c0_4] : memref<1x64xf32, #tpu.memory_space<vmem>>, vector<1x64xf32>
    %5 = vector.broadcast %4 : vector<1x64xf32> to vector<8x64xf32>
    %6 = arith.addf %3, %5 : vector<8x64xf32>
    %cst_5 = arith.constant 0.000000e+00 : f32
    %7 = vector.broadcast %cst_5 : f32 to vector<8x64xf32>
    %8 = arith.maximumf %6, %7 : vector<8x64xf32>
    %9 = arith.truncf %8 : vector<8x64xf32> to vector<8x64xbf16>
    %c0_6 = arith.constant 0 : index
    %c0_7 = arith.constant 0 : index
    %10 = vector.load %arg4[%c0_6, %c0_7] : memref<64x128xbf16, #tpu.memory_space<vmem>>, vector<64x128xbf16>
    %cst_8 = arith.constant dense<0.000000e+00> : vector<8x128xf32>
    %11 = tpu.matmul %9, %10, %cst_8 {dimension_numbers = #tpu.dot_dimension_numbers<[1], [0], [0], [1], [0, 0, 1, 1], [], []>} : vector<8x64xbf16>, vector<64x128xbf16>, vector<8x128xf32> -> vector<8x128xf32>
    %c0_9 = arith.constant 0 : index
    %c0_10 = arith.constant 0 : index
    %12 = vector.load %arg5[%c0_9, %c0_10] : memref<1x128xf32, #tpu.memory_space<vmem>>, vector<1x128xf32>
    %13 = vector.broadcast %12 : vector<1x128xf32> to vector<8x128xf32>
    %14 = arith.addf %11, %13 : vector<8x128xf32>
    %cst_11 = arith.constant 0.000000e+00 : f32
    %15 = vector.broadcast %cst_11 : f32 to vector<8x128xf32>
    %16 = arith.maximumf %14, %15 : vector<8x128xf32>
    %17 = arith.truncf %16 : vector<8x128xf32> to vector<8x128xbf16>
    %c0_12 = arith.constant 0 : index
    %c0_13 = arith.constant 0 : index
    %18 = vector.load %arg6[%c0_12, %c0_13] : memref<128x128xbf16, #tpu.memory_space<vmem>>, vector<128x128xbf16>
    %cst_14 = arith.constant dense<0.000000e+00> : vector<8x128xf32>
    %19 = tpu.matmul %17, %18, %cst_14 {dimension_numbers = #tpu.dot_dimension_numbers<[1], [0], [0], [1], [0, 0, 1, 1], [], []>} : vector<8x128xbf16>, vector<128x128xbf16>, vector<8x128xf32> -> vector<8x128xf32>
    %c0_15 = arith.constant 0 : index
    %c0_16 = arith.constant 0 : index
    %20 = vector.load %arg7[%c0_15, %c0_16] : memref<1x128xf32, #tpu.memory_space<vmem>>, vector<1x128xf32>
    %21 = vector.broadcast %20 : vector<1x128xf32> to vector<8x128xf32>
    %22 = arith.addf %19, %21 : vector<8x128xf32>
    %cst_17 = arith.constant 0.000000e+00 : f32
    %23 = vector.broadcast %cst_17 : f32 to vector<8x128xf32>
    %24 = arith.maximumf %22, %23 : vector<8x128xf32>
    %25 = arith.truncf %24 : vector<8x128xf32> to vector<8x128xbf16>
    %c0_18 = arith.constant 0 : index
    %c0_19 = arith.constant 0 : index
    %26 = vector.load %arg8[%c0_18, %c0_19] : memref<128x5xbf16, #tpu.memory_space<vmem>>, vector<128x5xbf16>
    %cst_20 = arith.constant dense<0.000000e+00> : vector<8x5xf32>
    %27 = tpu.matmul %25, %26, %cst_20 {dimension_numbers = #tpu.dot_dimension_numbers<[1], [0], [0], [1], [0, 0, 1, 1], [], []>} : vector<8x128xbf16>, vector<128x5xbf16>, vector<8x5xf32> -> vector<8x5xf32>
    %c0_21 = arith.constant 0 : index
    %c0_22 = arith.constant 0 : index
    %28 = vector.load %arg9[%c0_21, %c0_22] : memref<1x5xf32, #tpu.memory_space<vmem>>, vector<1x5xf32>
    %29 = vector.broadcast %28 : vector<1x5xf32> to vector<8x5xf32>
    %30 = arith.addf %27, %29 : vector<8x5xf32>
    %cst_23 = arith.constant 0.000000e+00 : f32
    %31 = vector.broadcast %cst_23 : f32 to vector<8x5xf32>
    %32 = arith.maximumf %30, %31 : vector<8x5xf32>
    %33 = vector.extract_strided_slice %32 {offsets = [0, 0], sizes = [8, 4], strides = [1, 1]} : vector<8x5xf32> to vector<8x4xf32>
    %34 = vector.extract_strided_slice %32 {offsets = [0, 4], sizes = [8, 1], strides = [1, 1]} : vector<8x5xf32> to vector<8x1xf32>
    %cst_24 = arith.constant dense<0.000000e+00> : vector<8xf32>
    %35 = vector.multi_reduction <add>, %33, %cst_24 [1] : vector<8x4xf32> to vector<8xf32>
    %36 = vector.shape_cast %35 : vector<8xf32> to vector<8x1xf32>
    %cst_25 = arith.constant 4.000000e+00 : f32
    %37 = vector.broadcast %cst_25 : f32 to vector<8x1xf32>
    %38 = arith.divf %36, %37 : vector<8x1xf32>
    %39 = vector.broadcast %34 : vector<8x1xf32> to vector<8x4xf32>
    %40 = arith.addf %39, %33 : vector<8x4xf32>
    %41 = vector.broadcast %38 : vector<8x1xf32> to vector<8x4xf32>
    %42 = arith.subf %40, %41 : vector<8x4xf32>
    %c0_26 = arith.constant 0 : index
    %c0_27 = arith.constant 0 : index
    %43 = vector.load %arg10[%c0_26, %c0_27] : memref<8x4xf32, #tpu.memory_space<vmem>>, vector<8x4xf32>
    tpu.vector_store %arg10[%c0_26, %c0_27], %42 {strides = array<i32>} : memref<8x4xf32, #tpu.memory_space<vmem>>, vector<8x4xf32>,
    return
  }
  func.func @transform_0(%arg0: i32) -> (i32, i32) {
    %c0_i32 = arith.constant 0 : i32
    %c0_i32_0 = arith.constant 0 : i32
    return %arg0, %c0_i32 : i32, i32
  }
  func.func @transform_1(%arg0: i32) -> (i32, i32) {
    %c0_i32 = arith.constant 0 : i32
    %c0_i32_0 = arith.constant 0 : i32
    %c0_i32_1 = arith.constant 0 : i32
    return %c0_i32, %c0_i32_0 : i32, i32
  }
  func.func @transform_2(%arg0: i32) -> (i32, i32) {
    %c0_i32 = arith.constant 0 : i32
    %c0_i32_0 = arith.constant 0 : i32
    %c0_i32_1 = arith.constant 0 : i32
    return %c0_i32, %c0_i32_0 : i32, i32
  }
  func.func @transform_3(%arg0: i32) -> (i32, i32) {
    %c0_i32 = arith.constant 0 : i32
    %c0_i32_0 = arith.constant 0 : i32
    %c0_i32_1 = arith.constant 0 : i32
    return %c0_i32, %c0_i32_0 : i32, i32
  }
  func.func @transform_4(%arg0: i32) -> (i32, i32) {
    %c0_i32 = arith.constant 0 : i32
    %c0_i32_0 = arith.constant 0 : i32
    %c0_i32_1 = arith.constant 0 : i32
    return %c0_i32, %c0_i32_0 : i32, i32
  }
  func.func @transform_5(%arg0: i32) -> (i32, i32) {
    %c0_i32 = arith.constant 0 : i32
    %c0_i32_0 = arith.constant 0 : i32
    %c0_i32_1 = arith.constant 0 : i32
    return %c0_i32, %c0_i32_0 : i32, i32
  }
  func.func @transform_6(%arg0: i32) -> (i32, i32) {
    %c0_i32 = arith.constant 0 : i32
    %c0_i32_0 = arith.constant 0 : i32
    %c0_i32_1 = arith.constant 0 : i32
    return %c0_i32, %c0_i32_0 : i32, i32
  }
  func.func @transform_7(%arg0: i32) -> (i32, i32) {
    %c0_i32 = arith.constant 0 : i32
    %c0_i32_0 = arith.constant 0 : i32
    %c0_i32_1 = arith.constant 0 : i32
    return %c0_i32, %c0_i32_0 : i32, i32
  }
  func.func @transform_8(%arg0: i32) -> (i32, i32) {
    %c0_i32 = arith.constant 0 : i32
    %c0_i32_0 = arith.constant 0 : i32
    %c0_i32_1 = arith.constant 0 : i32
    return %c0_i32, %c0_i32_0 : i32, i32
  }
  func.func @transform_9(%arg0: i32) -> (i32, i32) {
    %c0_i32 = arith.constant 0 : i32
    %c0_i32_0 = arith.constant 0 : i32
    return %arg0, %c0_i32 : i32, i32
  }
}

</mosaic_0001>

<bundles_post_ra>
// kernel: tpu_custom_call.1
= control target key start
LH: loop header
LB: loop body
LE: loop exit
PB: predicated region body
PF: predicated region fallthrough
CT: control target
= control target key end

     0   :  { %14 = vsyncpa [#allocation3], 0  ;;  %s596_s30 = smov [#allocation2]   ;;  %s762_s0 = inlined_call_operand.vmem [shape: f32[8,8], index: 0, kind: input, shape index: {}]   ;;  %s763_s1 = inlined_call_operand.vmem [shape: bf16[8,64], index: 1, kind: input, shape index: {}]   ;;  %s764_s2 = inlined_call_operand.vmem [shape: f32[1,64], index: 2, kind: input, shape index: {}]   ;;  %s765_s3 = inlined_call_operand.hbm [shape: bf16[64,128], index: 3, kind: input, shape index: {}]   ;;  %s766_s4 = inlined_call_operand.vmem [shape: f32[1,128], index: 4, kind: input, shape index: {}]   ;;  %s767_s5 = inlined_call_operand.vmem [shape: bf16[128,128], index: 5, kind: input, shape index: {}]   ;;  %s768_s6 = inlined_call_operand.vmem [shape: f32[1,128], index: 6, kind: input, shape index: {}]   ;;  %s769_s7 = inlined_call_operand.vmem [shape: bf16[128,5], index: 7, kind: input, shape index: {}]   ;;  %s770_s8 = inlined_call_operand.vmem [shape: f32[1,5], index: 8, kind: input, shape index: {}]   ;;  %s771_s9 = inlined_call_operand.vmem [shape: f32[8,4], index: 9, kind: output, shape index: {}]  }
   0x1   :  { %s26_s10 = sshll.u32 %s596_s30, 4  ;;  %s572_s13 = scalar_lea.hbm %s765_s3, 512  ;;  %s27_s10 = int_to_ptr.vmem [resolvable:$true] %s26_s10 }
   0x2   :  { %p573_p0 = scmp.ne.s32.totalorder %s765_s3, %s572_s13  ;;  %p576_p1 = scmp.lt.u32.totalorder %s572_s13, %s765_s3 }
   0x4   :  { %p578_p2 = pnand %p576_p1, %p573_p0 }
   0x6   :  { %581 = shalt.err (!%p578_p2)
}
   0x7   :  { %s582_s18 = scalar_lea.vmem %s27_s10, 512  ;;  %p587_p4 = scmp.lt.s32.totalorder %s27_s10, %s27_s10 }
   0x8   :  { %p583_p3 = scmp.ne.s32.totalorder %s27_s10, %s582_s18  ;;  %p588_p5 = scmp.lt.s32.totalorder %s582_s18, %s582_s18 }
   0xa   :  { %p589_p6 = por %p588_p5, %p587_p4 }
   0xc   :  { %p590_p7 = pnand %p589_p6, %p583_p3 }
   0xe   :  { %593 = shalt.err (!%p590_p7)
}
   0xf   :  { %s597_s19 = smov 64   ;;  %s598_s20 = smov 4  }
  0x10   :  { %32 = dma.hbm_to_vmem [thread:$0]  %s765_s3, 512, %s27_s10, [#allocation3], %s597_s19, %s597_s19, %s598_s20  }
  0x11   :  { %594 = dma.done.wait [#allocation3], 512  }
  0x12   :  { %595 = vsyncadd [#allocation3], 4294966784  ;;  %v599_v0 = vmov 0.0   ;;  %vm600_vm0 = vmmov 0   ;;  %vm61_vm1 = vcmask 1043456   ;;  %v47_v2 = vld [vmem:[%s762_s0] sm:$0xff] }
  0x13   :  { %487 = vmatprep.subr.bf16.mxu0 %v599_v0  ;;  %489 = vmatprep.mubr.msk.bf16.mxu0 %vm600_vm0, %v599_v0  ;;  %v49_v1 = vld [vmem:[%s763_s1] sm:$0xf]  ;;  %v48_v4 = vpack.c.bf16 %v47_v2, %v47_v2  ;;  %vm57_vm2 = vcmask 64512   ;;  %v553_v6 = vld [vmem:[#allocation2 + $0x8] sm:$0xff]   ;;  %v554_v7 = vld [vmem:[#allocation2 + $0x10] sm:$0xff]   ;;  %vm146_vm3 = vcmask 523264  }
  0x14   :  { %493 = vmatprep.subr.bf16.mxu1 %v599_v0  ;;  %501 = vmatprep.mubr.msk.bf16.mxu1 %vm600_vm0, %v599_v0  ;;  %v63_v3 = vsel %vm61_vm1, %v49_v1, 0  ;;  %v552_v5 = vld [vmem:[#allocation2] sm:$0xff]   ;;  %v555_v8 = vld [vmem:[#allocation2 + $0x18] sm:$0xff]   ;;  %v557_v10 = vld [vmem:[%s767_s5 + $0x8] sm:$0xff]   ;;  %v601_v49 = vmov 4   ;;  %vm417_vm4 = vcmask 31744  }
  0x15   :  { %488 = vmatpush3.bf16.msra.mxu0 %v63_v3  ;;  %494 = vmatpush3.bf16.msra.mxu1 %v552_v5  ;;  %v556_v9 = vld [vmem:[%s767_s5] sm:$0xff]   ;;  %v558_v11 = vld [vmem:[%s767_s5 + $0x10] sm:$0xff]   ;;  %v559_v12 = vld [vmem:[%s767_s5 + $0x18] sm:$0xff]  }
  0x16   :  { %505 = vmatprep.subr.bf16.mxu0 %v599_v0  ;;  %495 = vmatprep.subr.bf16.mxu1 %v599_v0  ;;  %v560_v13 = vld [vmem:[%s767_s5 + $0x20] sm:$0xff]   ;;  %v561_v14 = vld [vmem:[%s767_s5 + $0x28] sm:$0xff]   ;;  %v562_v23 = vld [vmem:[%s767_s5 + $0x30] sm:$0xff]  }
  0x17   :  { %v436_v15 = vld [vmem:[%s764_s2] ss:$0 sm:$0xff]  ;;  %v563_v24 = vld [vmem:[%s767_s5 + $0x38] sm:$0xff]   ;;  %v565_v26 = vld [vmem:[%s769_s7 + $0x8] sm:$0xff]   ;;  %551 = vset.pattern.permute.xlu0 %v601_v49 }
  0x18   :  { %490 = vmatmul.mubr.msk.bf16.vlgmr.msra.gmra.mrb[0].mxu0 %vm57_vm2, %v48_v4  ;;  %v564_v25 = vld [vmem:[%s769_s7] sm:$0xff]   ;;  %v566_v27 = vld [vmem:[%s769_s7 + $0x10] sm:$0xff]   ;;  %v567_v28 = vld [vmem:[%s769_s7 + $0x18] sm:$0xff]  }
  0x19   :  { %521 = vmatprep.mubr.msk.bf16.mxu0 %vm600_vm0, %v599_v0  ;;  %496 = vmatpush3.bf16.msra.mxu1 %v553_v6  ;;  %v568_v29 = vld [vmem:[%s769_s7 + $0x20] sm:$0xff]   ;;  %v569_v30 = vld [vmem:[%s769_s7 + $0x28] sm:$0xff]   ;;  %v570_v39 = vld [vmem:[%s769_s7 + $0x30] sm:$0xff]  }
  0x1a   :  { %497 = vmatprep.subr.bf16.mxu1 %v599_v0  ;;  %506 = vmatpush3.bf16.msra.mxu0 %v556_v9  ;;  %v438_v31 = vld [vmem:[%s766_s4] ss:$0 sm:$0xff]  ;;  %v571_v40 = vld [vmem:[%s769_s7 + $0x38] sm:$0xff]  }
  0x1b   :  { %507 = vmatprep.subr.bf16.mxu0 %v599_v0  ;;  %v444_v41 = vld [vmem:[%s768_s6] ss:$0 sm:$0xff] }
  0x1c   :  { %v453_v50 = vld [vmem:[%s770_s8] ss:$0 sm:$0xff] }
  0x1d   :  { %498 = vmatpush3.bf16.msra.mxu1 %v554_v7 }
  0x1e   :  { %499 = vmatprep.subr.bf16.mxu1 %v599_v0  ;;  %508 = vmatpush3.bf16.msra.mxu0 %v557_v10 }
  0x1f   :  { %509 = vmatprep.subr.bf16.mxu0 %v599_v0 }
  0x21   :  { %500 = vmatpush3.bf16.msra.mxu1 %v555_v8 }
  0x22   :  { %525 = vmatprep.subr.bf16.mxu1 %v599_v0  ;;  %510 = vmatpush3.bf16.msra.mxu0 %v558_v11 }
  0x23   :  { %511 = vmatprep.subr.bf16.mxu0 %v599_v0 }
  0x26   :  { %512 = vmatpush3.bf16.msra.mxu0 %v559_v12 }
  0x27   :  { %513 = vmatprep.subr.bf16.mxu0 %v599_v0 }
  0x2a   :  { %514 = vmatpush3.bf16.msra.mxu0 %v560_v13 }
  0x2b   :  { %515 = vmatprep.subr.bf16.mxu0 %v599_v0 }
  0x2e   :  { %516 = vmatpush3.bf16.msra.mxu0 %v561_v14 }
  0x2f   :  { %517 = vmatprep.subr.bf16.mxu0 %v599_v0 }
  0x32   :  { %518 = vmatpush3.bf16.msra.mxu0 %v562_v23 }
  0x33   :  { %519 = vmatprep.subr.bf16.mxu0 %v599_v0 }
  0x36   :  { %520 = vmatpush3.bf16.msra.mxu0 %v563_v24 }
  0xeb   :  { %v99_v16 = vpop.f32.mrb[0].mxu0 }
  0xec   :  { %v100_v17 = vadd.f32 %v436_v15, %v99_v16  ;;  %v491_v18 = vpop.f32.mrb[1].mxu0 }
  0xed   :  { %v102_v19 = vpop.f32.mrb[2].mxu0 }
  0xee   :  { %v105_v20 = vmax.f32 %v100_v17, 0.0  ;;  %v492_v21 = vpop.f32.mrb[3].mxu0 }
  0xf0   :  { %v106_v22 = vpack.c.bf16 %v105_v20, %v105_v20 }
  0xf2   :  { %502 = vmatmul.mubr.msk.bf16.vlgmr.msra.gmra.mrb[0].mxu1 %vm146_vm3, %v106_v22 }
  0xf3   :  { %541 = vmatprep.mubr.msk.bf16.mxu1 %vm600_vm0, %v599_v0  ;;  %526 = vmatpush3.bf16.msra.mxu1 %v564_v25 }
  0xf4   :  { %527 = vmatprep.subr.bf16.mxu1 %v599_v0 }
  0xf7   :  { %528 = vmatpush3.bf16.msra.mxu1 %v565_v26 }
  0xf8   :  { %529 = vmatprep.subr.bf16.mxu1 %v599_v0 }
  0xfb   :  { %530 = vmatpush3.bf16.msra.mxu1 %v566_v27 }
  0xfc   :  { %531 = vmatprep.subr.bf16.mxu1 %v599_v0 }
  0xff   :  { %532 = vmatpush3.bf16.msra.mxu1 %v567_v28 }
 0x100   :  { %533 = vmatprep.subr.bf16.mxu1 %v599_v0 }
 0x103   :  { %534 = vmatpush3.bf16.msra.mxu1 %v568_v29 }
 0x104   :  { %535 = vmatprep.subr.bf16.mxu1 %v599_v0 }
 0x107   :  { %536 = vmatpush3.bf16.msra.mxu1 %v569_v30 }
 0x108   :  { %537 = vmatprep.subr.bf16.mxu1 %v599_v0 }
 0x10b   :  { %538 = vmatpush3.bf16.msra.mxu1 %v570_v39 }
 0x10c   :  { %539 = vmatprep.subr.bf16.mxu1 %v599_v0 }
 0x10f   :  { %540 = vmatpush3.bf16.msra.mxu1 %v571_v40 }
 0x1c5   :  { %v184_v32 = vpop.f32.mrb[0].mxu1 }
 0x1c6   :  { %v185_v33 = vadd.f32 %v438_v31, %v184_v32  ;;  %v503_v34 = vpop.f32.mrb[1].mxu1 }
 0x1c7   :  { %v187_v35 = vpop.f32.mrb[2].mxu1 }
 0x1c8   :  { %v190_v36 = vmax.f32 %v185_v33, 0.0  ;;  %v504_v37 = vpop.f32.mrb[3].mxu1 }
 0x1ca   :  { %v191_v38 = vpack.c.bf16 %v190_v36, %v190_v36 }
 0x1cc   :  { %522 = vmatmul.mubr.bf16.vlgmr.msra.gmra.mrb[4].mxu0 %v191_v38 }
 0x29f   :  { %v297_v42 = vpop.f32.mrb[4].mxu0 }
 0x2a0   :  { %v298_v43 = vadd.f32 %v444_v41, %v297_v42  ;;  %v523_v44 = vpop.f32.mrb[5].mxu0 }
 0x2a1   :  { %v300_v45 = vpop.f32.mrb[6].mxu0 }
 0x2a2   :  { %v303_v46 = vmax.f32 %v298_v43, 0.0  ;;  %v524_v47 = vpop.f32.mrb[7].mxu0 }
 0x2a4   :  { %v304_v48 = vpack.c.bf16 %v303_v46, %v303_v46 }
 0x2a6   :  { %542 = vmatmul.mubr.bf16.vlgmr.msra.gmra.mrb[4].mxu1 %v304_v48 }
 0x379   :  { %v410_v51 = vpop.f32.mrb[4].mxu1 }
 0x37a   :  { %v411_v52 = vadd.f32 %v453_v50, %v410_v51  ;;  %v543_v53 = vpop.f32.mrb[5].mxu1 }
 0x37b   :  { %v413_v54 = vpop.f32.mrb[6].mxu1 }
 0x37c   :  { %v416_v55 = vmax.f32 %v411_v52, 0.0  ;;  %v544_v56 = vpop.f32.mrb[7].mxu1 }
 0x37e   :  { %v418_v57 = vsel %vm417_vm4, %v416_v55, 0.0 }
 0x37f   :  { %419 = vadd.xlane.f32.xlu0 %v418_v57 }
 0x395   :  { %425 = vperm.xlu0 %551, %v416_v55  }
 0x40c   :  { %v420_v58 = vpop.xlane.xlu0 %419 }
 0x40d   :  { %v422_v60 = vmul.f32 0.25, %v420_v58 }
 0x414   :  { %v426_v59 = vpop.permute.xlu0 %425 }
 0x415   :  { %v428_v61 = vadd.f32 %v426_v59, %v416_v55 }
 0x417   :  { %v429_v62 = vsub.f32 %v428_v61, %v422_v60 }
 0x419   :  { %430 = vst.msk [vmem:[%s771_s9] sm:$0xff] %vm417_vm4, %v429_v62 }
 0x41a   :  { %435 = vsyncpa [#allocation3], 1 }

</bundles_post_ra>
